<compile_context>
chip_gen: v5e
topology: v5e:2x2
jax: 0.10.0
libtpu: 0.0.40
codegen_flags: <defaults>
</compile_context>

<pallas_src>
import jax
import jax.numpy as jnp
from jax.experimental import pallas as pl
from jax.experimental.pallas import tpu as pltpu


LAYER_DIMS = ((325, 250), (250, 150), (150, 100), (100, 52))
IN_DIM = LAYER_DIMS[0][0]
OUT_DIM = LAYER_DIMS[-1][1]


def _round_up(x, m):
    return (x + m - 1) // m * m


def _cdiv(a, b):
    return -(-a // b)


def _cuore_kernel(x_ref,
                  w1_ref, b1_ref,
                  w2_ref, b2_ref,
                  w3_ref, b3_ref,
                  w4_ref, b4_ref,
                  o_ref):
    # One (TB, 384) bf16 batch tile; four padded layers back-to-back on the
    # MXU. bf16 dot inputs for layers 1-3, f32 for the final layer; f32
    # accumulation, bias add, ReLU and the +1e-4 everywhere.
    h = x_ref[...]  # already bf16 from HBM

    h = jnp.dot(h, w1_ref[...], preferred_element_type=jnp.float32) + b1_ref[...]
    h = jnp.maximum(h, 0.0).astype(jnp.bfloat16)

    h = jnp.dot(h, w2_ref[...], preferred_element_type=jnp.float32) + b2_ref[...]
    h = jnp.maximum(h, 0.0).astype(jnp.bfloat16)

    h = jnp.dot(h, w3_ref[...], preferred_element_type=jnp.float32) + b3_ref[...]
    h = jnp.maximum(h, 0.0)  # stays f32: final layer runs in full precision

    h = jnp.dot(h, w4_ref[...], preferred_element_type=jnp.float32) + b4_ref[...]
    h = jnp.maximum(h, 0.0)

    # F.relu(...) + 0.0001 * ones((1, 52)) broadcasts over the batch dim; the
    # padded output columns are sliced away in the wrapper.
    o_ref[...] = h + jnp.float32(1e-4)


def init_params(key):
    """PyTorch nn.Linear-style uniform init; weights stored (in, out) = W^T."""
    params = []
    for (fan_in, fan_out) in LAYER_DIMS:
        key, kw, kb = jax.random.split(key, 3)
        bound = 1.0 / float(fan_in) ** 0.5
        w = jax.random.uniform(kw, (fan_in, fan_out), jnp.float32, -bound, bound)
        b = jax.random.uniform(kb, (1, fan_out), jnp.float32, -bound, bound)
        params.append((w, b))
    return params


def prepare_params(params):
    """Zero-pad every feature dim to a multiple of 128.

    Layers 1-3 weights -> bf16 (MXU native); the final layer's weights stay
    f32 (precision of the small +1e-4 offset). Biases stay f32.
    """
    padded = []
    n_layers = len(params)
    for li, (w, b) in enumerate(params):
        fi, fo = w.shape
        fi_p, fo_p = _round_up(fi, 128), _round_up(fo, 128)
        w_dtype = jnp.float32 if li == n_layers - 1 else jnp.bfloat16
        wp = jnp.zeros((fi_p, fo_p), w_dtype).at[:fi, :fo].set(w.astype(w_dtype))
        bp = jnp.zeros((1, fo_p), jnp.float32).at[:, :fo].set(b)
        padded.append((wp, bp))
    return padded


def cuore_forward(game_state, memory, padded_params, *, block_b=4096):
    """Pallas forward pass. `memory` is unused, mirroring the PyTorch module."""
    del memory  # Cuore.forward never reads it
    (w1, b1), (w2, b2), (w3, b3), (w4, b4) = padded_params

    B, in_dim = game_state.shape
    B_eff = max(B, 1)
    in_pad = w1.shape[0]
    out_pad = w4.shape[1]

    weight_args = (w1, b1, w2, b2, w3, b3, w4, b4)
    weight_bytes = sum(int(a.size) * a.dtype.itemsize for a in weight_args)

    # --- Adaptive batch tiling -------------------------------------------
    # Minimal padding: split B into cdiv(B, block_b) tiles, each rounded up to
    # a multiple of 16 (bf16 sublane packing). Force >=2 grid steps for
    # medium/large batches so the "parallel" axis splits across both v7x TCs
    # (free on single-TC v5e/v6e: one extra ~0.35us grid step).
    num_tiles = _cdiv(B_eff, block_b)
    if num_tiles == 1 and B_eff >= 512:
        num_tiles = 2
    tb = _round_up(_cdiv(B_eff, num_tiles), 16)

    # --- Generation-aware VMEM budget ------------------------------------
    def _vmem_budget(t):
        x_bytes = 2 * t * in_pad * 2        # double-buffered bf16 x tiles
        o_bytes = 2 * t * out_pad * 4       # double-buffered f32 out tiles
        act_bytes = 5 * t * 256 * 4         # intermediate activations (generous)
        return weight_bytes + x_bytes + o_bytes + act_bytes + (4 << 20)

    try:
        info = pltpu.get_tpu_info()
        vmem_cap = int(getattr(info, "vmem_capacity_bytes", 64 << 20))
    except Exception:  # pragma: no cover - conservative fallback
        vmem_cap = 64 << 20
    ceiling = min(96 << 20, (vmem_cap * 3) // 4)   # ~48 MiB on v7x, 96 MiB on v5e/v6e

    # Safeguard: shrink the tile if the estimated budget would not fit.
    while _vmem_budget(tb) > ceiling and tb > 256:
        num_tiles += 1
        tb = _round_up(_cdiv(B_eff, num_tiles), 16)

    b_pad = num_tiles * tb
    grid = (num_tiles,)
    vmem_limit = int(min(max(_vmem_budget(tb), 32 << 20), ceiling))

    # --- Fused cast + zero-pad of x (single wrapper op, bf16) -------------
    x = game_state.astype(jnp.bfloat16)
    if b_pad != B or in_pad != in_dim:
        x = jnp.zeros((b_pad, in_pad), jnp.bfloat16).at[:B, :in_dim].set(x)

    weight_specs = [pl.BlockSpec(a.shape, lambda i: (0, 0)) for a in weight_args]

    # Advisory cost: real FLOPs, actual padded transfer sizes.
    flops = 2 * B_eff * sum(fi * fo for fi, fo in LAYER_DIMS)
    bytes_accessed = b_pad * in_pad * 2 + weight_bytes + b_pad * out_pad * 4
    cost = pl.CostEstimate(flops=flops, transcendentals=0,
                           bytes_accessed=bytes_accessed)

    out_padded = pl.pallas_call(
        _cuore_kernel,
        out_shape=jax.ShapeDtypeStruct((b_pad, out_pad), jnp.float32),
        grid=grid,
        in_specs=[pl.BlockSpec((tb, in_pad), lambda i: (i, 0))] + weight_specs,
        out_specs=pl.BlockSpec((tb, out_pad), lambda i: (i, 0)),
        compiler_params=pltpu.CompilerParams(
            dimension_semantics=("parallel",),
            vmem_limit_bytes=vmem_limit),
        cost_estimate=cost,
    )(x, *weight_args)

    # Padded batch rows carry bias->ReLU->+1e-4 garbage; the [:B] slice removes
    # them, and [:, :OUT_DIM] strips the zero-padded output columns.
    return out_padded[:B, :OUT_DIM]


def reference_forward(game_state, params):
    x = game_state
    for (w, b) in params:
        x = jnp.maximum(x @ w + b, 0.0)
    return x + 1e-4


if __name__ == "__main__":
    key = jax.random.PRNGKey(0)
    key, kx, km, kp = jax.random.split(key, 4)

    B = 2
    game_state = jax.random.normal(kx, (B, IN_DIM), jnp.float32)
    memory = jax.random.normal(km, (B, 8), jnp.float32)  # unused by forward
    params = init_params(kp)
    padded_params = prepare_params(params)

    out = cuore_forward(game_state, memory, padded_params)
    out = jax.block_until_ready(out)

    ref = reference_forward(game_state, params)
    assert out.shape == (B, OUT_DIM)
    # bf16 matmul inputs (layers 1-3) with f32 accumulation -> loose tolerance
    # vs. the pure-f32 reference.
    max_err = float(jnp.max(jnp.abs(out - ref)))
    assert jnp.allclose(out, ref, atol=5e-2, rtol=5e-2), max_err

    print("KERNEL_OK")
</pallas_src>

<mosaic_0001>
module attributes {stable_mosaic.version = 11 : i64} {
  func.func @_cuore_kernel(%arg0: i32, %arg1: memref<16x384xbf16, #tpu.memory_space<vmem>>, %arg2: memref<384x256xbf16, #tpu.memory_space<vmem>>, %arg3: memref<1x256xf32, #tpu.memory_space<vmem>>, %arg4: memref<256x256xbf16, #tpu.memory_space<vmem>>, %arg5: memref<1x256xf32, #tpu.memory_space<vmem>>, %arg6: memref<256x128xbf16, #tpu.memory_space<vmem>>, %arg7: memref<1x128xf32, #tpu.memory_space<vmem>>, %arg8: memref<128x128xf32, #tpu.memory_space<vmem>>, %arg9: memref<1x128xf32, #tpu.memory_space<vmem>>, %arg10: memref<16x128xf32, #tpu.memory_space<vmem>>) attributes {dimension_semantics = [#tpu.dimension_semantics<parallel>], iteration_bounds = array<i64: 1>, scalar_prefetch = 0 : i64, scratch_operands = 0 : i64, tpu.core_type = #tpu.core_type<tc>, window_params = [{transform_indices = @transform_0, window_bounds = array<i64: 16, 384>}, {pipeline_mode = #tpu.pipeline_mode<synchronous>, transform_indices = @transform_1, window_bounds = array<i64: 384, 256>}, {pipeline_mode = #tpu.pipeline_mode<synchronous>, transform_indices = @transform_2, window_bounds = array<i64: 1, 256>}, {pipeline_mode = #tpu.pipeline_mode<synchronous>, transform_indices = @transform_3, window_bounds = array<i64: 256, 256>}, {pipeline_mode = #tpu.pipeline_mode<synchronous>, transform_indices = @transform_4, window_bounds = array<i64: 1, 256>}, {pipeline_mode = #tpu.pipeline_mode<synchronous>, transform_indices = @transform_5, window_bounds = array<i64: 256, 128>}, {pipeline_mode = #tpu.pipeline_mode<synchronous>, transform_indices = @transform_6, window_bounds = array<i64: 1, 128>}, {pipeline_mode = #tpu.pipeline_mode<synchronous>, transform_indices = @transform_7, window_bounds = array<i64: 128, 128>}, {pipeline_mode = #tpu.pipeline_mode<synchronous>, transform_indices = @transform_8, window_bounds = array<i64: 1, 128>}, {transform_indices = @transform_9, window_bounds = array<i64: 16, 128>}]} {
    %c0 = arith.constant 0 : index
    %c0_0 = arith.constant 0 : index
    %0 = vector.load %arg1[%c0, %c0_0] : memref<16x384xbf16, #tpu.memory_space<vmem>>, vector<16x384xbf16>
    %c0_1 = arith.constant 0 : index
    %c0_2 = arith.constant 0 : index
    %1 = vector.load %arg2[%c0_1, %c0_2] : memref<384x256xbf16, #tpu.memory_space<vmem>>, vector<384x256xbf16>
    %cst = arith.constant dense<0.000000e+00> : vector<16x256xf32>
    %2 = tpu.matmul %0, %1, %cst {dimension_numbers = #tpu.dot_dimension_numbers<[1], [0], [0], [1], [0, 0, 1, 1], [], []>} : vector<16x384xbf16>, vector<384x256xbf16>, vector<16x256xf32> -> vector<16x256xf32>
    %c0_3 = arith.constant 0 : index
    %c0_4 = arith.constant 0 : index
    %3 = vector.load %arg3[%c0_3, %c0_4] : memref<1x256xf32, #tpu.memory_space<vmem>>, vector<1x256xf32>
    %4 = vector.broadcast %3 : vector<1x256xf32> to vector<16x256xf32>
    %5 = arith.addf %2, %4 : vector<16x256xf32>
    %cst_5 = arith.constant 0.000000e+00 : f32
    %6 = vector.broadcast %cst_5 : f32 to vector<16x256xf32>
    %7 = arith.maximumf %5, %6 : vector<16x256xf32>
    %8 = arith.truncf %7 : vector<16x256xf32> to vector<16x256xbf16>
    %c0_6 = arith.constant 0 : index
    %c0_7 = arith.constant 0 : index
    %9 = vector.load %arg4[%c0_6, %c0_7] : memref<256x256xbf16, #tpu.memory_space<vmem>>, vector<256x256xbf16>
    %cst_8 = arith.constant dense<0.000000e+00> : vector<16x256xf32>
    %10 = tpu.matmul %8, %9, %cst_8 {dimension_numbers = #tpu.dot_dimension_numbers<[1], [0], [0], [1], [0, 0, 1, 1], [], []>} : vector<16x256xbf16>, vector<256x256xbf16>, vector<16x256xf32> -> vector<16x256xf32>
    %c0_9 = arith.constant 0 : index
    %c0_10 = arith.constant 0 : index
    %11 = vector.load %arg5[%c0_9, %c0_10] : memref<1x256xf32, #tpu.memory_space<vmem>>, vector<1x256xf32>
    %12 = vector.broadcast %11 : vector<1x256xf32> to vector<16x256xf32>
    %13 = arith.addf %10, %12 : vector<16x256xf32>
    %cst_11 = arith.constant 0.000000e+00 : f32
    %14 = vector.broadcast %cst_11 : f32 to vector<16x256xf32>
    %15 = arith.maximumf %13, %14 : vector<16x256xf32>
    %16 = arith.truncf %15 : vector<16x256xf32> to vector<16x256xbf16>
    %c0_12 = arith.constant 0 : index
    %c0_13 = arith.constant 0 : index
    %17 = vector.load %arg6[%c0_12, %c0_13] : memref<256x128xbf16, #tpu.memory_space<vmem>>, vector<256x128xbf16>
    %cst_14 = arith.constant dense<0.000000e+00> : vector<16x128xf32>
    %18 = tpu.matmul %16, %17, %cst_14 {dimension_numbers = #tpu.dot_dimension_numbers<[1], [0], [0], [1], [0, 0, 1, 1], [], []>} : vector<16x256xbf16>, vector<256x128xbf16>, vector<16x128xf32> -> vector<16x128xf32>
    %c0_15 = arith.constant 0 : index
    %c0_16 = arith.constant 0 : index
    %19 = vector.load %arg7[%c0_15, %c0_16] : memref<1x128xf32, #tpu.memory_space<vmem>>, vector<1x128xf32>
    %20 = vector.broadcast %19 : vector<1x128xf32> to vector<16x128xf32>
    %21 = arith.addf %18, %20 : vector<16x128xf32>
    %cst_17 = arith.constant 0.000000e+00 : f32
    %22 = vector.broadcast %cst_17 : f32 to vector<16x128xf32>
    %23 = arith.maximumf %21, %22 : vector<16x128xf32>
    %c0_18 = arith.constant 0 : index
    %c0_19 = arith.constant 0 : index
    %24 = vector.load %arg8[%c0_18, %c0_19] : memref<128x128xf32, #tpu.memory_space<vmem>>, vector<128x128xf32>
    %cst_20 = arith.constant dense<0.000000e+00> : vector<16x128xf32>
    %25 = tpu.matmul %23, %24, %cst_20 {dimension_numbers = #tpu.dot_dimension_numbers<[1], [0], [0], [1], [0, 0, 1, 1], [], []>} : vector<16x128xf32>, vector<128x128xf32>, vector<16x128xf32> -> vector<16x128xf32>
    %c0_21 = arith.constant 0 : index
    %c0_22 = arith.constant 0 : index
    %26 = vector.load %arg9[%c0_21, %c0_22] : memref<1x128xf32, #tpu.memory_space<vmem>>, vector<1x128xf32>
    %27 = vector.broadcast %26 : vector<1x128xf32> to vector<16x128xf32>
    %28 = arith.addf %25, %27 : vector<16x128xf32>
    %cst_23 = arith.constant 0.000000e+00 : f32
    %29 = vector.broadcast %cst_23 : f32 to vector<16x128xf32>
    %30 = arith.maximumf %28, %29 : vector<16x128xf32>
    %cst_24 = arith.constant 9.99999974E-5 : f32
    %31 = vector.broadcast %cst_24 : f32 to vector<16x128xf32>
    %32 = arith.addf %30, %31 : vector<16x128xf32>
    %c0_25 = arith.constant 0 : index
    %c0_26 = arith.constant 0 : index
    %33 = vector.load %arg10[%c0_25, %c0_26] : memref<16x128xf32, #tpu.memory_space<vmem>>, vector<16x128xf32>
    tpu.vector_store %arg10[%c0_25, %c0_26], %32 {strides = array<i32>} : memref<16x128xf32, #tpu.memory_space<vmem>>, vector<16x128xf32>,
    return
  }
  func.func @transform_0(%arg0: i32) -> (i32, i32) {
    %c0_i32 = arith.constant 0 : i32
    %c0_i32_0 = arith.constant 0 : i32
    return %arg0, %c0_i32 : i32, i32
  }
  func.func @transform_1(%arg0: i32) -> (i32, i32) {
    %c0_i32 = arith.constant 0 : i32
    %c0_i32_0 = arith.constant 0 : i32
    %c0_i32_1 = arith.constant 0 : i32
    return %c0_i32, %c0_i32_0 : i32, i32
  }
  func.func @transform_2(%arg0: i32) -> (i32, i32) {
    %c0_i32 = arith.constant 0 : i32
    %c0_i32_0 = arith.constant 0 : i32
    %c0_i32_1 = arith.constant 0 : i32
    return %c0_i32, %c0_i32_0 : i32, i32
  }
  func.func @transform_3(%arg0: i32) -> (i32, i32) {
    %c0_i32 = arith.constant 0 : i32
    %c0_i32_0 = arith.constant 0 : i32
    %c0_i32_1 = arith.constant 0 : i32
    return %c0_i32, %c0_i32_0 : i32, i32
  }
  func.func @transform_4(%arg0: i32) -> (i32, i32) {
    %c0_i32 = arith.constant 0 : i32
    %c0_i32_0 = arith.constant 0 : i32
    %c0_i32_1 = arith.constant 0 : i32
    return %c0_i32, %c0_i32_0 : i32, i32
  }
  func.func @transform_5(%arg0: i32) -> (i32, i32) {
    %c0_i32 = arith.constant 0 : i32
    %c0_i32_0 = arith.constant 0 : i32
    %c0_i32_1 = arith.constant 0 : i32
    return %c0_i32, %c0_i32_0 : i32, i32
  }
  func.func @transform_6(%arg0: i32) -> (i32, i32) {
    %c0_i32 = arith.constant 0 : i32
    %c0_i32_0 = arith.constant 0 : i32
    %c0_i32_1 = arith.constant 0 : i32
    return %c0_i32, %c0_i32_0 : i32, i32
  }
  func.func @transform_7(%arg0: i32) -> (i32, i32) {
    %c0_i32 = arith.constant 0 : i32
    %c0_i32_0 = arith.constant 0 : i32
    %c0_i32_1 = arith.constant 0 : i32
    return %c0_i32, %c0_i32_0 : i32, i32
  }
  func.func @transform_8(%arg0: i32) -> (i32, i32) {
    %c0_i32 = arith.constant 0 : i32
    %c0_i32_0 = arith.constant 0 : i32
    %c0_i32_1 = arith.constant 0 : i32
    return %c0_i32, %c0_i32_0 : i32, i32
  }
  func.func @transform_9(%arg0: i32) -> (i32, i32) {
    %c0_i32 = arith.constant 0 : i32
    %c0_i32_0 = arith.constant 0 : i32
    return %arg0, %c0_i32 : i32, i32
  }
}

</mosaic_0001>

<bundles_post_ra>
// kernel: tpu_custom_call.1
= control target key start
LH: loop header
LB: loop body
LE: loop exit
PB: predicated region body
PF: predicated region fallthrough
CT: control target
= control target key end

     0   :  { %14 = vsyncpa [#allocation3], 0  ;;  %s1839_s0 = inlined_call_operand.hbm [shape: bf16[16,384], index: 0, kind: input, shape index: {}]   ;;  %s1840_s1 = inlined_call_operand.hbm [shape: bf16[384,256], index: 1, kind: input, shape index: {}]   ;;  %s1841_s2 = inlined_call_operand.hbm [shape: f32[1,256], index: 2, kind: input, shape index: {}]   ;;  %s1842_s3 = inlined_call_operand.hbm [shape: bf16[256,256], index: 3, kind: input, shape index: {}]   ;;  %s1843_s4 = inlined_call_operand.vmem [shape: f32[1,256], index: 4, kind: input, shape index: {}]   ;;  %s1844_s5 = inlined_call_operand.hbm [shape: bf16[256,128], index: 5, kind: input, shape index: {}]   ;;  %s1845_s6 = inlined_call_operand.vmem [shape: f32[1,128], index: 6, kind: input, shape index: {}]   ;;  %s1846_s7 = inlined_call_operand.hbm [shape: f32[128,128], index: 7, kind: input, shape index: {}]   ;;  %s1847_s8 = inlined_call_operand.vmem [shape: f32[1,128], index: 8, kind: input, shape index: {}]   ;;  %s1848_s9 = inlined_call_operand.hbm [shape: f32[16,128], index: 9, kind: output, shape index: {}]  }
   0x1   :  { %15 = vsyncpa [#allocation6], 0 }
   0x2   :  { %16 = vsyncpa [#allocation9], 0 }
   0x3   :  { %17 = vsyncpa [#allocation12], 0  ;;  %s36_s11 = sshll.u32 %s1840_s1, 4  ;;  %s37_s11 = int_to_ptr.hbm [resolvable:$true] %s36_s11 }
   0x4   :  { %18 = vsyncpa [#allocation4], 0  ;;  %s1726_s12 = smov [#allocation5]   ;;  %s60_s16 = sshll.u32 %s1842_s3, 4  ;;  %s61_s16 = int_to_ptr.hbm [resolvable:$true] %s60_s16 }
   0x5   :  { %s38_s13 = sshll.u32 %s1726_s12, 4  ;;  %s1727_s17 = smov 128   ;;  %s39_s13 = int_to_ptr.vmem [resolvable:$true] %s38_s13 }
   0x6   :  { %s1728_s18 = smov 8   ;;  %s1729_s19 = smov [#allocation8]  }
   0x7   :  { %44 = dma.hbm_to_vmem [thread:$0]  %s37_s11, 6144, %s39_s13, [#allocation6], %s1727_s17, %s1727_s17, %s1728_s18  }
   0x8   :  { %s62_s20 = sshll.u32 %s1729_s19, 4  ;;  %s23_s22 = sshll.u32 %s1839_s0, 4  ;;  %s63_s20 = int_to_ptr.vmem [resolvable:$true] %s62_s20  ;;  %s24_s22 = int_to_ptr.hbm [resolvable:$true] %s23_s22 }
   0x9   :  { %68 = dma.hbm_to_vmem [thread:$0]  %s61_s16, 4096, %s63_s20, [#allocation9], %s1727_s17, %s1727_s17, %s1728_s18  }
   0xa   :  { %s1730_s3 = smov [#allocation2]   ;;  %s50_s26 = sshll.u32 %s1841_s2, 4  ;;  %s51_s26 = int_to_ptr.hbm [resolvable:$true] %s50_s26 }
   0xb   :  { %s25_s23 = sshll.u32 %s1730_s3, 4  ;;  %s1731_s27 = smov 192   ;;  %s26_s23 = int_to_ptr.vmem [resolvable:$true] %s25_s23 }
   0xc   :  { %s1732_s28 = smov 12   ;;  %s1733_s29 = smov [#allocation7]  }
   0xd   :  { %31 = dma.hbm_to_vmem [thread:$0]  %s24_s22, 384, %s26_s23, [#allocation3], %s1731_s27, %s1731_s27, %s1732_s28  }
   0xe   :  { %s52_s30 = sshll.u32 %s1733_s29, 4  ;;  %s75_s11 = sshll.u32 %s1844_s5, 4  ;;  %s53_s30 = int_to_ptr.vmem [resolvable:$true] %s52_s30  ;;  %s76_s11 = int_to_ptr.hbm [resolvable:$true] %s75_s11 }
   0xf   :  { %55 = dma.hbm_to_vmem [thread:$0]  %s51_s26, 32, %s53_s30, [#allocation6]  }
  0x10   :  { %s1734_s12 = smov [#allocation10]   ;;  %s90_s2 = sshll.u32 %s1846_s7, 4  ;;  %s91_s2 = int_to_ptr.hbm [resolvable:$true] %s90_s2 }
  0x11   :  { %s77_s13 = sshll.u32 %s1734_s12, 4  ;;  %s1735_s16 = smov 64   ;;  %s78_s13 = int_to_ptr.vmem [resolvable:$true] %s77_s13 }
  0x12   :  { %s1736_s19 = smov 4   ;;  %s1737_s20 = smov [#allocation11]  }
  0x13   :  { %83 = dma.hbm_to_vmem [thread:$0]  %s76_s11, 2048, %s78_s13, [#allocation9], %s1735_s16, %s1735_s16, %s1736_s19  }
  0x14   :  { %s92_s21 = sshll.u32 %s1737_s20, 4  ;;  %s93_s21 = int_to_ptr.vmem [resolvable:$true] %s92_s21 }
  0x15   :  { %98 = dma.hbm_to_vmem [thread:$0]  %s91_s2, 2048, %s93_s21, [#allocation12], %s1727_s17, %s1727_s17, %s1728_s18  }
  0x16   :  { %1716 = dma.done.wait [#allocation3], 384  }
  0x17   :  { %1717 = vsyncadd [#allocation3], 4294966912 }
  0x18   :  { %1718 = dma.done.wait [#allocation6], 6176  }
  0x19   :  { %1719 = vsyncadd [#allocation6], 4294961120 }
  0x1a   :  { %1720 = dma.done.wait [#allocation9], 6144  }
  0x1b   :  { %1721 = vsyncadd [#allocation9], 4294961152 }
  0x1c   :  { %1722 = dma.done.wait [#allocation12], 2048  }
  0x1d   :  { %1723 = vsyncadd [#allocation12], 4294965248  ;;  %v1092_v0 = vld [vmem:[#allocation5 + $0x70] sm:$0xf]  ;;  %v1436_v1 = vld [vmem:[#allocation5 + $0x74] sm:$0xf0] }
  0x1e   :  { %v1156_v2 = vld [vmem:[#allocation5 + $0xf0] sm:$0xf]  ;;  %v1093_v3 = vor.u32 %v1436_v1, %v1092_v0  ;;  %v1452_v4 = vld [vmem:[#allocation5 + $0xf4] sm:$0xf0]  ;;  %v1084_v9 = vld [vmem:[#allocation5 + $0x60] sm:$0xf] }
  0x1f   :  { %v1220_v5 = vld [vmem:[#allocation5 + $0x170] sm:$0xf]  ;;  %v1468_v6 = vld [vmem:[#allocation5 + $0x174] sm:$0xf0]  ;;  %v1157_v7 = vor.u32 %v1452_v4, %v1156_v2  ;;  %v1434_v10 = vld [vmem:[#allocation5 + $0x64] sm:$0xf0] }
  0x20   :  { %v1221_v8 = vor.u32 %v1468_v6, %v1220_v5  ;;  %v1148_v11 = vld [vmem:[#allocation5 + $0xe0] sm:$0xf]  ;;  %439 = vmatpush.bf16.msra.mxu0 %v1093_v3  ;;  %v1085_v12 = vor.u32 %v1434_v10, %v1084_v9  ;;  %v1450_v13 = vld [vmem:[#allocation5 + $0xe4] sm:$0xf0]  ;;  %v1076_v18 = vld [vmem:[#allocation5 + $0x50] sm:$0xf] }
  0x21   :  { %v1212_v14 = vld [vmem:[#allocation5 + $0x160] sm:$0xf]  ;;  %v1466_v15 = vld [vmem:[#allocation5 + $0x164] sm:$0xf0]  ;;  %453 = vmatpush.bf16.msra.mxu1 %v1157_v7  ;;  %v1149_v16 = vor.u32 %v1450_v13, %v1148_v11  ;;  %v1432_v19 = vld [vmem:[#allocation5 + $0x54] sm:$0xf0] }
  0x22   :  { %467 = vmatpush.bf16.msra.mxu2 %v1221_v8  ;;  %v1213_v17 = vor.u32 %v1466_v15, %v1212_v14  ;;  %v1140_v20 = vld [vmem:[#allocation5 + $0xd0] sm:$0xf]  ;;  %v1448_v21 = vld [vmem:[#allocation5 + $0xd4] sm:$0xf0]  ;;  %v1077_v24 = vor.u32 %v1432_v19, %v1076_v18  ;;  %v1068_v25 = vld [vmem:[#allocation5 + $0x40] sm:$0xf] }
  0x23   :  { %v1204_v22 = vld [vmem:[#allocation5 + $0x150] sm:$0xf]  ;;  %v1464_v23 = vld [vmem:[#allocation5 + $0x154] sm:$0xf0]  ;;  %v1430_v26 = vld [vmem:[#allocation5 + $0x44] sm:$0xf0]  ;;  %v1141_v27 = vor.u32 %v1448_v21, %v1140_v20 }
  0x24   :  { %440 = vmatpush.bf16.msra.mxu0 %v1085_v12  ;;  %v1205_v28 = vor.u32 %v1464_v23, %v1204_v22  ;;  %v1132_v29 = vld [vmem:[#allocation5 + $0xc0] sm:$0xf]  ;;  %v1435_v30 = vld [vmem:[#allocation5 + $0x74] sm:$0xf]  ;;  %v1094_v31 = vld [vmem:[#allocation5 + $0x78] sm:$0xf0]  ;;  %v1069_v37 = vor.u32 %v1430_v26, %v1068_v25 }
  0x25   :  { %454 = vmatpush.bf16.msra.mxu1 %v1149_v16  ;;  %v1446_v32 = vld [vmem:[#allocation5 + $0xc4] sm:$0xf0]  ;;  %v1196_v33 = vld [vmem:[#allocation5 + $0x140] sm:$0xf]  ;;  %v1097_v35 = vor.u32 %v1435_v30, %v1094_v31  ;;  %v1433_v36 = vld [vmem:[#allocation5 + $0x64] sm:$0xf] }
  0x26   :  { %468 = vmatpush.bf16.msra.mxu2 %v1213_v17  ;;  %v1462_v34 = vld [vmem:[#allocation5 + $0x144] sm:$0xf0]  ;;  %v1060_v38 = vld [vmem:[#allocation5 + $0x30] sm:$0xf]  ;;  %v1428_v39 = vld [vmem:[#allocation5 + $0x34] sm:$0xf0]  ;;  %v1133_v41 = vor.u32 %v1446_v32, %v1132_v29 }
  0x27   :  { %481 = vmatpush.bf16.msra.mxu3 %v1097_v35  ;;  %v1086_v40 = vld [vmem:[#allocation5 + $0x68] sm:$0xf0]  ;;  %v1197_v42 = vor.u32 %v1462_v34, %v1196_v33  ;;  %v1124_v43 = vld [vmem:[#allocation5 + $0xb0] sm:$0xf]  ;;  %v1444_v44 = vld [vmem:[#allocation5 + $0xb4] sm:$0xf0]  ;;  %v1061_v50 = vor.u32 %v1428_v39, %v1060_v38 }
  0x28   :  { %441 = vmatpush.bf16.msra.mxu0 %v1077_v24  ;;  %v1188_v45 = vld [vmem:[#allocation5 + $0x130] sm:$0xf]  ;;  %v1089_v46 = vor.u32 %v1433_v36, %v1086_v40  ;;  %v1460_v47 = vld [vmem:[#allocation5 + $0x134] sm:$0xf0]  ;;  %v1431_v48 = vld [vmem:[#allocation5 + $0x54] sm:$0xf]  ;;  %v1125_v54 = vor.u32 %v1444_v44, %v1124_v43 }
  0x29   :  { %455 = vmatpush.bf16.msra.mxu1 %v1141_v27  ;;  %v1078_v49 = vld [vmem:[#allocation5 + $0x58] sm:$0xf0]  ;;  %v1052_v51 = vld [vmem:[#allocation5 + $0x20] sm:$0xf]  ;;  %v1426_v52 = vld [vmem:[#allocation5 + $0x24] sm:$0xf0]  ;;  %v1189_v55 = vor.u32 %v1460_v47, %v1188_v45 }
  0x2a   :  { %469 = vmatpush.bf16.msra.mxu2 %v1205_v28  ;;  %v1081_v53 = vor.u32 %v1431_v48, %v1078_v49  ;;  %v1116_v56 = vld [vmem:[#allocation5 + $0xa0] sm:$0xf]  ;;  %v1429_v57 = vld [vmem:[#allocation5 + $0x44] sm:$0xf]  ;;  %v1070_v58 = vld [vmem:[#allocation5 + $0x48] sm:$0xf0]  ;;  %v1053_v62 = vor.u32 %v1426_v52, %v1052_v51 }
  0x2b   :  { %482 = vmatpush.bf16.msra.mxu3 %v1089_v46  ;;  %v1442_v59 = vld [vmem:[#allocation5 + $0xa4] sm:$0xf0]  ;;  %v1180_v60 = vld [vmem:[#allocation5 + $0x120] sm:$0xf]  ;;  %v1044_v63 = vld [vmem:[#allocation5 + $0x10] sm:$0xf]  ;;  %v1073_v1 = vor.u32 %v1429_v57, %v1070_v58 }
  0x2c   :  { %442 = vmatpush.bf16.msra.mxu0 %v1069_v37  ;;  %v1458_v61 = vld [vmem:[#allocation5 + $0x124] sm:$0xf0]  ;;  %v1424_v0 = vld [vmem:[#allocation5 + $0x14] sm:$0xf0]  ;;  %v1117_v2 = vor.u32 %v1442_v59, %v1116_v56  ;;  %v1108_v4 = vld [vmem:[#allocation5 + $0x90] sm:$0xf] }
  0x2d   :  { %456 = vmatpush.bf16.msra.mxu1 %v1133_v41  ;;  %v1181_v3 = vor.u32 %v1458_v61, %v1180_v60  ;;  %v1427_v5 = vld [vmem:[#allocation5 + $0x34] sm:$0xf]  ;;  %v1062_v6 = vld [vmem:[#allocation5 + $0x38] sm:$0xf0]  ;;  %v1440_v7 = vld [vmem:[#allocation5 + $0x94] sm:$0xf0]  ;;  %v1045_v10 = vor.u32 %v1424_v0, %v1044_v63 }
  0x2e   :  { %470 = vmatpush.bf16.msra.mxu2 %v1197_v42  ;;  %v1172_v8 = vld [vmem:[#allocation5 + $0x110] sm:$0xf]  ;;  %v1456_v9 = vld [vmem:[#allocation5 + $0x114] sm:$0xf0]  ;;  %v1036_v11 = vld [vmem:[#allocation5] sm:$0xf]  ;;  %v1065_v14 = vor.u32 %v1427_v5, %v1062_v6  ;;  %v1109_v15 = vor.u32 %v1440_v7, %v1108_v4 }
  0x2f   :  { %483 = vmatpush.bf16.msra.mxu3 %v1081_v53  ;;  %v1422_v12 = vld [vmem:[#allocation5 + $0x4] sm:$0xf0]  ;;  %v1100_v13 = vld [vmem:[#allocation5 + $0x80] sm:$0xf]  ;;  %v1173_v16 = vor.u32 %v1456_v9, %v1172_v8  ;;  %v1425_v18 = vld [vmem:[#allocation5 + $0x24] sm:$0xf] }
  0x30   :  { %443 = vmatpush.bf16.msra.mxu0 %v1061_v50  ;;  %v1438_v17 = vld [vmem:[#allocation5 + $0x84] sm:$0xf0]  ;;  %v1054_v19 = vld [vmem:[#allocation5 + $0x28] sm:$0xf0]  ;;  %v1164_v20 = vld [vmem:[#allocation5 + $0x100] sm:$0xf]  ;;  %v1037_v26 = vor.u32 %v1422_v12, %v1036_v11 }
  0x31   :  { %457 = vmatpush.bf16.msra.mxu1 %v1125_v54  ;;  %v1454_v21 = vld [vmem:[#allocation5 + $0x104] sm:$0xf0]  ;;  %v1451_v22 = vld [vmem:[#allocation5 + $0xf4] sm:$0xf]  ;;  %v1158_v23 = vld [vmem:[#allocation5 + $0xf8] sm:$0xf0]  ;;  %v1057_v30 = vor.u32 %v1425_v18, %v1054_v19  ;;  %v1101_v31 = vor.u32 %v1438_v17, %v1100_v13 }
  0x32   :  { %471 = vmatpush.bf16.msra.mxu2 %v1189_v55  ;;  %v1467_v24 = vld [vmem:[#allocation5 + $0x174] sm:$0xf]  ;;  %v1222_v25 = vld [vmem:[#allocation5 + $0x178] sm:$0xf0]  ;;  %v1032_v27 = vld [vmem:[#allocation2 + $0x8] sm:$0xf]  ;;  %v1165_v32 = vor.u32 %v1454_v21, %v1164_v20  ;;  %v1161_v36 = vor.u32 %v1451_v22, %v1158_v23 }
  0x33   :  { %484 = vmatpush.bf16.msra.mxu3 %v1073_v1  ;;  %v1024_v28 = vld [vmem:[#allocation2] sm:$0xf]  ;;  %v1419_v29 = vld [vmem:[#allocation2 + $0x8] sm:$0xf0]  ;;  %v1420_v33 = vld [vmem:[#allocation2 + $0x10] sm:$0xf0]  ;;  %v1225_v37 = vor.u32 %v1467_v24, %v1222_v25 }
  0x34   :  { %444 = vmatpush.bf16.msra.mxu0 %v1053_v62  ;;  %v1418_v34 = vld [vmem:[#allocation2 + $0x4] sm:$0xf]  ;;  %v1026_v35 = vld [vmem:[#allocation2 + $0xc] sm:$0xf0]  ;;  %v1449_v38 = vld [vmem:[#allocation5 + $0xe4] sm:$0xf]  ;;  %v1025_v41 = vor.u32 %v1419_v29, %v1024_v28  ;;  %v1816_v45 = vor.u32 %v1420_v33, %v1032_v27 }
  0x35   :  { %458 = vmatpush.bf16.msra.mxu1 %v1117_v2  ;;  %v1423_v39 = vld [vmem:[#allocation5 + $0x14] sm:$0xf]  ;;  %v1046_v40 = vld [vmem:[#allocation5 + $0x18] sm:$0xf0]  ;;  %v1150_v42 = vld [vmem:[#allocation5 + $0xe8] sm:$0xf0]  ;;  %v1818_v46 = vor.u32 %v1418_v34, %v1026_v35 }
  0x36   :  { %472 = vmatpush.bf16.msra.mxu2 %v1181_v3  ;;  %v1465_v43 = vld [vmem:[#allocation5 + $0x164] sm:$0xf]  ;;  %v1214_v44 = vld [vmem:[#allocation5 + $0x168] sm:$0xf0]  ;;  %v1049_v47 = vor.u32 %v1423_v39, %v1046_v40  ;;  %v1447_v48 = vld [vmem:[#allocation5 + $0xd4] sm:$0xf]  ;;  %v1153_v50 = vor.u32 %v1449_v38, %v1150_v42 }
  0x37   :  { %485 = vmatpush.bf16.msra.mxu3 %v1065_v14  ;;  %v1142_v49 = vld [vmem:[#allocation5 + $0xd8] sm:$0xf0]  ;;  %v1217_v51 = vor.u32 %v1465_v43, %v1214_v44  ;;  %v1463_v52 = vld [vmem:[#allocation5 + $0x154] sm:$0xf]  ;;  %v1421_v53 = vld [vmem:[#allocation5 + $0x4] sm:$0xf] }
  0x38   :  { %445 = vmatpush.bf16.msra.mxu0 %v1045_v10  ;;  %v1038_v54 = vld [vmem:[#allocation5 + $0x8] sm:$0xf0]  ;;  %v1206_v55 = vld [vmem:[#allocation5 + $0x158] sm:$0xf0]  ;;  %v1284_v56 = vld [vmem:[#allocation8 + $0x70] sm:$0xf]  ;;  %v1145_v62 = vor.u32 %v1447_v48, %v1142_v49 }
  0x39   :  { %459 = vmatpush.bf16.msra.mxu1 %v1109_v15  ;;  %v1484_v57 = vld [vmem:[#allocation8 + $0x74] sm:$0xf0]  ;;  %v1276_v59 = vld [vmem:[#allocation8 + $0x60] sm:$0xf]  ;;  %v1482_v60 = vld [vmem:[#allocation8 + $0x64] sm:$0xf0]  ;;  %v1041_v61 = vor.u32 %v1421_v53, %v1038_v54  ;;  %v1209_v63 = vor.u32 %v1463_v52, %v1206_v55 }
  0x3a   :  { %473 = vmatpush.bf16.msra.mxu2 %v1173_v16  ;;  %v1285_v58 = vor.u32 %v1484_v57, %v1284_v56  ;;  %v1445_v0 = vld [vmem:[#allocation5 + $0xc4] sm:$0xf]  ;;  %v1134_v1 = vld [vmem:[#allocation5 + $0xc8] sm:$0xf0]  ;;  %v1277_v4 = vor.u32 %v1482_v60, %v1276_v59  ;;  %v1268_v5 = vld [vmem:[#allocation8 + $0x50] sm:$0xf] }
  0x3b   :  { %486 = vmatpush.bf16.msra.mxu3 %v1057_v30  ;;  %v1461_v2 = vld [vmem:[#allocation5 + $0x144] sm:$0xf]  ;;  %v1198_v3 = vld [vmem:[#allocation5 + $0x148] sm:$0xf0]  ;;  %v1480_v6 = vld [vmem:[#allocation8 + $0x54] sm:$0xf0]  ;;  %v1137_v7 = vor.u32 %v1445_v0, %v1134_v1 }
  0x3c   :  { %446 = vmatpush.bf16.msra.mxu0 %v1037_v26  ;;  %v1201_v8 = vor.u32 %v1461_v2, %v1198_v3  ;;  %v1443_v9 = vld [vmem:[#allocation5 + $0xb4] sm:$0xf]  ;;  %v1126_v10 = vld [vmem:[#allocation5 + $0xb8] sm:$0xf0]  ;;  %v1269_v13 = vor.u32 %v1480_v6, %v1268_v5  ;;  %v1441_v16 = vld [vmem:[#allocation5 + $0xa4] sm:$0xf] }
  0x3d   :  { %460 = vmatpush.bf16.msra.mxu1 %v1101_v31  ;;  %v1459_v11 = vld [vmem:[#allocation5 + $0x134] sm:$0xf]  ;;  %v1190_v12 = vld [vmem:[#allocation5 + $0x138] sm:$0xf0]  ;;  %v1129_v14 = vor.u32 %v1443_v9, %v1126_v10  ;;  %v1118_v17 = vld [vmem:[#allocation5 + $0xa8] sm:$0xf0] }
  0x3e   :  { %474 = vmatpush.bf16.msra.mxu2 %v1165_v32  ;;  %v1193_v15 = vor.u32 %v1459_v11, %v1190_v12  ;;  %v1457_v18 = vld [vmem:[#allocation5 + $0x124] sm:$0xf]  ;;  %v1182_v19 = vld [vmem:[#allocation5 + $0x128] sm:$0xf0]  ;;  %v1121_v20 = vor.u32 %v1441_v16, %v1118_v17  ;;  %v1439_v22 = vld [vmem:[#allocation5 + $0x94] sm:$0xf] }
  0x3f   :  { %447 = vmatmul.bf16.vlgmr.msra.gmra.mxu0 %v1025_v41  ;;  %487 = vmatpush.bf16.msra.mxu3 %v1049_v47  ;;  %v1185_v21 = vor.u32 %v1457_v18, %v1182_v19  ;;  %v1110_v23 = vld [vmem:[#allocation5 + $0x98] sm:$0xf0]  ;;  %v1455_v24 = vld [vmem:[#allocation5 + $0x114] sm:$0xf]  ;;  %v1437_v28 = vld [vmem:[#allocation5 + $0x84] sm:$0xf] }
  0x40   :  { %495 = vmatpush.bf16.msrb.mxu0 %v1161_v36  ;;  %461 = vmatmul.bf16.vlgmr.msra.gmra.mxu1 %v1818_v46  ;;  %v1174_v25 = vld [vmem:[#allocation5 + $0x118] sm:$0xf0]  ;;  %v1113_v26 = vor.u32 %v1439_v22, %v1110_v23  ;;  %v1102_v29 = vld [vmem:[#allocation5 + $0x88] sm:$0xf0]  ;;  %v1453_v30 = vld [vmem:[#allocation5 + $0x104] sm:$0xf] }
  0x41   :  { %509 = vmatpush.bf16.msrb.mxu1 %v1225_v37  ;;  %475 = vmatmul.bf16.vlgmr.msra.gmra.mxu2 %v1816_v45  ;;  %v1177_v27 = vor.u32 %v1455_v24, %v1174_v25  ;;  %v1166_v31 = vld [vmem:[#allocation5 + $0x108] sm:$0xf0]  ;;  %v1483_v32 = vld [vmem:[#allocation8 + $0x74] sm:$0xf]  ;;  %v1286_v33 = vld [vmem:[#allocation8 + $0x78] sm:$0xf0]  ;;  %v1105_v34 = vor.u32 %v1437_v28, %v1102_v29 }
  0x42   :  { %727 = vmatpush.bf16.msrb.mxu2 %v1285_v58  ;;  %v1169_v35 = vor.u32 %v1453_v30, %v1166_v31  ;;  %v1289_v36 = vor.u32 %v1483_v32, %v1286_v33  ;;  %v1481_v37 = vld [vmem:[#allocation8 + $0x64] sm:$0xf]  ;;  %v1278_v38 = vld [vmem:[#allocation8 + $0x68] sm:$0xf0]  ;;  %v1479_v40 = vld [vmem:[#allocation8 + $0x54] sm:$0xf] }
  0x43   :  { %488 = vmatpush.bf16.msra.mxu3 %v1041_v61  ;;  %v1281_v39 = vor.u32 %v1481_v37, %v1278_v38  ;;  %v1260_v43 = vld [vmem:[#allocation8 + $0x40] sm:$0xf]  ;;  %v1478_v44 = vld [vmem:[#allocation8 + $0x44] sm:$0xf0]  ;;  %v1477_v47 = vld [vmem:[#allocation8 + $0x44] sm:$0xf] }
  0x44   :  { %496 = vmatpush.bf16.msrb.mxu0 %v1153_v50  ;;  %v1261_v48 = vor.u32 %v1478_v44, %v1260_v43  ;;  %v1262_v49 = vld [vmem:[#allocation8 + $0x48] sm:$0xf0]  ;;  %v1476_v52 = vld [vmem:[#allocation8 + $0x34] sm:$0xf0]  ;;  %v1475_v53 = vld [vmem:[#allocation8 + $0x34] sm:$0xf] }
  0x45   :  { %510 = vmatpush.bf16.msrb.mxu1 %v1217_v51  ;;  %v1265_v50 = vor.u32 %v1477_v47, %v1262_v49  ;;  %v1252_v51 = vld [vmem:[#allocation8 + $0x30] sm:$0xf]  ;;  %v1254_v55 = vld [vmem:[#allocation8 + $0x38] sm:$0xf0]  ;;  %v1473_v57 = vld [vmem:[#allocation8 + $0x24] sm:$0xf] }
  0x46   :  { %728 = vmatpush.bf16.msrb.mxu2 %v1277_v4  ;;  %489 = vmatmul.bf16.vlgmr.msra.gmra.mxu3 %v1025_v41  ;;  %v1270_v41 = vld [vmem:[#allocation8 + $0x58] sm:$0xf0]  ;;  %v1253_v54 = vor.u32 %v1476_v52, %v1252_v51  ;;  %v1257_v56 = vor.u32 %v1475_v53, %v1254_v55  ;;  %v1246_v59 = vld [vmem:[#allocation8 + $0x28] sm:$0xf0]  ;;  %v1236_v61 = vld [vmem:[#allocation8 + $0x10] sm:$0xf] }
  0x47   :  { %v1273_v42 = vor.u32 %v1479_v40, %v1270_v41  ;;  %v1249_v60 = vor.u32 %v1473_v57, %v1246_v59  ;;  %v1238_v1 = vld [vmem:[#allocation8 + $0x18] sm:$0xf0]  ;;  %v1348_v2 = vld [vmem:[#allocation8 + $0xf0] sm:$0xf]  ;;  %v1500_v3 = vld [vmem:[#allocation8 + $0xf4] sm:$0xf0] }
  0x48   :  { %497 = vmatpush.bf16.msrb.mxu0 %v1145_v62  ;;  %v1472_v62 = vld [vmem:[#allocation8 + $0x14] sm:$0xf0]  ;;  %v1349_v5 = vor.u32 %v1500_v3, %v1348_v2  ;;  %v1499_v6 = vld [vmem:[#allocation8 + $0xf4] sm:$0xf]  ;;  %v1228_v9 = vld [vmem:[#allocation8] sm:$0xf] }
  0x49   :  { %511 = vmatpush.bf16.msrb.mxu1 %v1209_v63  ;;  %v1471_v63 = vld [vmem:[#allocation8 + $0x14] sm:$0xf]  ;;  %v1237_v0 = vor.u32 %v1472_v62, %v1236_v61  ;;  %v1470_v10 = vld [vmem:[#allocation8 + $0x4] sm:$0xf0]  ;;  %v1469_v11 = vld [vmem:[#allocation8 + $0x4] sm:$0xf] }
  0x4a   :  { %729 = vmatpush.bf16.msrb.mxu2 %v1269_v13  ;;  %v1241_v4 = vor.u32 %v1471_v63, %v1238_v1  ;;  %741 = vmatpush.bf16.msrb.mxu3 %v1349_v5  ;;  %v1229_v12 = vor.u32 %v1470_v10, %v1228_v9  ;;  %v1230_v13 = vld [vmem:[#allocation8 + $0x8] sm:$0xf0]  ;;  %v1497_v18 = vld [vmem:[#allocation8 + $0xe4] sm:$0xf]  ;;  %v1496_v22 = vld [vmem:[#allocation8 + $0xd4] sm:$0xf0] }
  0x4b   :  { %v1233_v16 = vor.u32 %v1469_v11, %v1230_v13  ;;  %v1342_v19 = vld [vmem:[#allocation8 + $0xe8] sm:$0xf0]  ;;  %v1495_v23 = vld [vmem:[#allocation8 + $0xd4] sm:$0xf]  ;;  %v1334_v25 = vld [vmem:[#allocation8 + $0xd8] sm:$0xf0] }
  0x4c   :  { %498 = vmatpush.bf16.msrb.mxu0 %v1137_v7  ;;  %v1350_v7 = vld [vmem:[#allocation8 + $0xf8] sm:$0xf0]  ;;  %v1494_v28 = vld [vmem:[#allocation8 + $0xc4] sm:$0xf0]  ;;  %v1493_v29 = vld [vmem:[#allocation8 + $0xc4] sm:$0xf] }
  0x4d   :  { %512 = vmatpush.bf16.msrb.mxu1 %v1201_v8  ;;  %v1353_v8 = vor.u32 %v1499_v6, %v1350_v7  ;;  %v1326_v31 = vld [vmem:[#allocation8 + $0xc8] sm:$0xf0]  ;;  %v177_v33 = vld [vmem:[#allocation7] sm:$0x3]  ;;  %v1308_v43 = vld [vmem:[#allocation8 + $0xa0] sm:$0xf] }
  0x4e   :  { %730 = vmatpush.bf16.msrb.mxu2 %v1261_v48  ;;  %v1329_v32 = vor.u32 %v1493_v29, %v1326_v31  ;;  %v1318_v38 = vld [vmem:[#allocation8 + $0xb8] sm:$0xf0]  ;;  %v179_v40 = vperm.slane %v177_v33, 0  ;;  %v1490_v44 = vld [vmem:[#allocation8 + $0xa4] sm:$0xf0]  ;;  %v180_v11 = vperm.slane %v177_v33, 1 }
  0x4f   :  { %v1489_v47 = vld [vmem:[#allocation8 + $0xa4] sm:$0xf]  ;;  %v1309_v48 = vor.u32 %v1490_v44, %v1308_v43  ;;  %v1310_v49 = vld [vmem:[#allocation8 + $0xa8] sm:$0xf0]  ;;  %v1300_v52 = vld [vmem:[#allocation8 + $0x90] sm:$0xf] }
  0x50   :  { %499 = vmatpush.bf16.msrb.mxu0 %v1129_v14  ;;  %v1340_v14 = vld [vmem:[#allocation8 + $0xe0] sm:$0xf]  ;;  %v1488_v53 = vld [vmem:[#allocation8 + $0x94] sm:$0xf0]  ;;  %v1486_v62 = vld [vmem:[#allocation8 + $0x84] sm:$0xf0] }
  0x51   :  { %513 = vmatpush.bf16.msrb.mxu1 %v1193_v15  ;;  %v1498_v15 = vld [vmem:[#allocation8 + $0xe4] sm:$0xf0]  ;;  %v1301_v55 = vor.u32 %v1488_v53, %v1300_v52  ;;  %v1292_v61 = vld [vmem:[#allocation8 + $0x80] sm:$0xf]  ;;  %v1485_v63 = vld [vmem:[#allocation8 + $0x84] sm:$0xf] }
  0x52   :  { %731 = vmatpush.bf16.msrb.mxu2 %v1253_v54  ;;  %v1341_v17 = vor.u32 %v1498_v15, %v1340_v14  ;;  %v1487_v54 = vld [vmem:[#allocation8 + $0x94] sm:$0xf]  ;;  %v1294_v1 = vld [vmem:[#allocation8 + $0x88] sm:$0xf0]  ;;  %v1513_v31 = vld [vmem:[#allocation10 + $0x60] sm:$0xff]  ;;  %s1006_s26 = sshll.u32 %s1848_s9, 4  ;;  %s1007_s26 = int_to_ptr.hbm [resolvable:$true] %s1006_s26 }
  0x53   :  { %v1297_v2 = vor.u32 %v1485_v63, %v1294_v1  ;;  %v1514_v29 = vld [vmem:[#allocation10 + $0x68] sm:$0xff]  ;;  %v1512_v33 = vld [vmem:[#allocation10 + $0x58] sm:$0xff]  ;;  %v965_v43 = vld [vmem:[#allocation11 + $0x70] sm:$0xff] }
  0x54   :  { %500 = vmatpush.bf16.msrb.mxu0 %v1121_v20  ;;  %v1345_v20 = vor.u32 %v1497_v18, %v1342_v19  ;;  %742 = vmatpush.bf16.msrb.mxu3 %v1341_v17  ;;  %v964_v44 = vld [vmem:[#allocation11 + $0x68] sm:$0xff] }
  0x55   :  { %514 = vmatpush.bf16.msrb.mxu1 %v1185_v21  ;;  %v1332_v21 = vld [vmem:[#allocation8 + $0xd0] sm:$0xf]  ;;  %v960_v52 = vld [vmem:[#allocation11 + $0x48] sm:$0xff] }
  0x56   :  { %v1333_v24 = vor.u32 %v1496_v22, %v1332_v21 }
  0x58   :  { %501 = vmatpush.bf16.msrb.mxu0 %v1113_v26  ;;  %v1337_v26 = vor.u32 %v1495_v23, %v1334_v25  ;;  %743 = vmatpush.bf16.msrb.mxu3 %v1333_v24 }
  0x59   :  { %515 = vmatpush.bf16.msrb.mxu1 %v1177_v27  ;;  %v1324_v27 = vld [vmem:[#allocation8 + $0xc0] sm:$0xf] }
  0x5a   :  { %v1325_v30 = vor.u32 %v1494_v28, %v1324_v27  ;;  %v1515_v27 = vld [vmem:[#allocation10 + $0x70] sm:$0xff]  ;;  %v1508_v28 = vld [vmem:[#allocation10 + $0x38] sm:$0xff] }
  0x5c   :  { %502 = vmatpush.bf16.msrb.mxu0 %v1105_v34  ;;  %744 = vmatpush.bf16.msrb.mxu3 %v1325_v30  ;;  %v1316_v34 = vld [vmem:[#allocation8 + $0xb0] sm:$0xf] }
  0x5d   :  { %516 = vmatpush.bf16.msrb.mxu1 %v1169_v35  ;;  %v1492_v35 = vld [vmem:[#allocation8 + $0xb4] sm:$0xf0]  ;;  %v1507_v30 = vld [vmem:[#allocation10 + $0x30] sm:$0xff] }
  0x5e   :  { %v1317_v37 = vor.u32 %v1492_v35, %v1316_v34  ;;  %v1505_v34 = vld [vmem:[#allocation10 + $0x20] sm:$0xff]  ;;  %v1511_v35 = vld [vmem:[#allocation10 + $0x50] sm:$0xff] }
  0x5f   :  { %503 = vmatmul.bf16.vlgmr.msrb.gmra.mxu0 %v1818_v46  ;;  %v1474_v46 = vld [vmem:[#allocation8 + $0x24] sm:$0xf0] }
  0x60   :  { %755 = vmatpush.bf16.msra.mxu0 %v1289_v36  ;;  %517 = vmatmul.bf16.vlgmr.msrb.gmra.mxu1 %v1816_v45  ;;  %v1244_v45 = vld [vmem:[#allocation8 + $0x20] sm:$0xf]  ;;  %v1491_v36 = vld [vmem:[#allocation8 + $0xb4] sm:$0xf] }
  0x61   :  { %v1245_v58 = vor.u32 %v1474_v46, %v1244_v45  ;;  %769 = vmatpush.bf16.msra.mxu1 %v1353_v8  ;;  %745 = vmatpush.bf16.msrb.mxu3 %v1317_v37  ;;  %v1510_v37 = vld [vmem:[#allocation10 + $0x48] sm:$0xff] }
  0x63   :  { %732 = vmatpush.bf16.msrb.mxu2 %v1245_v58 }
  0x64   :  { %756 = vmatpush.bf16.msra.mxu0 %v1281_v39  ;;  %v1321_v39 = vor.u32 %v1491_v36, %v1318_v38  ;;  %v1504_v36 = vld [vmem:[#allocation10 + $0x18] sm:$0xff]  ;;  %v1503_v38 = vld [vmem:[#allocation10 + $0x10] sm:$0xff] }
  0x65   :  { %770 = vmatpush.bf16.msra.mxu1 %v1345_v20  ;;  %746 = vmatpush.bf16.msrb.mxu3 %v1309_v48 }
  0x67   :  { %733 = vmatpush.bf16.msrb.mxu2 %v1237_v0  ;;  %v1293_v0 = vor.u32 %v1486_v62, %v1292_v61 }
  0x68   :  { %757 = vmatpush.bf16.msra.mxu0 %v1273_v42 }
  0x69   :  { %771 = vmatpush.bf16.msra.mxu1 %v1337_v26  ;;  %747 = vmatpush.bf16.msrb.mxu3 %v1301_v55  ;;  %v1516_v26 = vld [vmem:[#allocation10 + $0x78] sm:$0xff] }
  0x6b   :  { %734 = vmatpush.bf16.msrb.mxu2 %v1229_v12 }
  0x6c   :  { %758 = vmatpush.bf16.msra.mxu0 %v1265_v50  ;;  %v1313_v50 = vor.u32 %v1489_v47, %v1310_v49  ;;  %v963_v47 = vld [vmem:[#allocation11 + $0x60] sm:$0xff]  ;;  %v962_v49 = vld [vmem:[#allocation11 + $0x58] sm:$0xff] }
  0x6d   :  { %772 = vmatpush.bf16.msra.mxu1 %v1329_v32  ;;  %748 = vmatpush.bf16.msrb.mxu3 %v1293_v0  ;;  %v1506_v32 = vld [vmem:[#allocation10 + $0x28] sm:$0xff] }
  0x6f   :  { %921 = vmatpush.bf16.msra.mxu2 %v1508_v28 }
  0x70   :  { %759 = vmatpush.bf16.msra.mxu0 %v1257_v56  ;;  %v1302_v56 = vld [vmem:[#allocation8 + $0x98] sm:$0xf0] }
  0x71   :  { %773 = vmatpush.bf16.msra.mxu1 %v1321_v39  ;;  %v1305_v46 = vor.u32 %v1487_v54, %v1302_v56  ;;  %935 = vmatpush.bf16.msra.mxu3 %v1516_v26  ;;  %v1509_v39 = vld [vmem:[#allocation10 + $0x40] sm:$0xff] }
  0x72   :  { %v959_v56 = vld [vmem:[#allocation11 + $0x40] sm:$0xff] }
  0x73   :  { %922 = vmatpush.bf16.msra.mxu2 %v1507_v30  ;;  %v1547_v30 = vld [vmem:[%s1847_s8] ss:$0 sm:$0xff] }
  0x74   :  { %760 = vmatpush.bf16.msra.mxu0 %v1249_v60 }
  0x75   :  { %774 = vmatpush.bf16.msra.mxu1 %v1313_v50  ;;  %936 = vmatpush.bf16.msra.mxu3 %v1515_v27  ;;  %v961_v50 = vld [vmem:[#allocation11 + $0x50] sm:$0xff] }
  0x77   :  { %923 = vmatpush.bf16.msra.mxu2 %v1506_v32 }
  0x78   :  { %761 = vmatpush.bf16.msra.mxu0 %v1241_v4 }
  0x79   :  { %775 = vmatpush.bf16.msra.mxu1 %v1305_v46  ;;  %937 = vmatpush.bf16.msra.mxu3 %v1514_v29 }
  0x7b   :  { %924 = vmatpush.bf16.msra.mxu2 %v1505_v34 }
  0x7c   :  { %762 = vmatpush.bf16.msra.mxu0 %v1233_v16 }
  0x7d   :  { %776 = vmatpush.bf16.msra.mxu1 %v1297_v2  ;;  %938 = vmatpush.bf16.msra.mxu3 %v1513_v31 }
  0x7f   :  { %925 = vmatpush.bf16.msra.mxu2 %v1504_v36 }
  0x81   :  { %939 = vmatpush.bf16.msra.mxu3 %v1512_v33 }
  0x83   :  { %926 = vmatpush.bf16.msra.mxu2 %v1503_v38 }
  0x85   :  { %940 = vmatpush.bf16.msra.mxu3 %v1511_v35 }
  0x89   :  { %941 = vmatpush.bf16.msra.mxu3 %v1510_v37 }
  0x8d   :  { %942 = vmatpush.bf16.msra.mxu3 %v1509_v39 }
  0xbc   :  { %v448_v41 = vpop.f32.mrf.mxu0 }
  0xbd   :  { %v462_v42 = vpop.f32.mrf.mxu1  ;;  %v449_v51 = vadd.f32 %v448_v41, %v179_v40  ;;  %v1501_v41 = vld [vmem:[#allocation10] sm:$0xff] }
  0xbf   :  { %v463_v57 = vadd.f32 %v462_v42, %v449_v51  ;;  %v966_v42 = vld [vmem:[#allocation11 + $0x78] sm:$0xff]  ;;  %v561_v51 = vld [vmem:[%s1843_s4] sm:$0x3] }
  0xc0   :  { %971 = vmatpush.msrb.mxu0 %v966_v42  ;;  %1517 = vmatpush.msrb.mxu1 %v966_v42  ;;  %v564_v55 = vperm.slane %v561_v51, 1 }
  0xc2   :  { %972 = vmatpush.msrb.mxu0 %v965_v43  ;;  %1518 = vmatpush.msrb.mxu1 %v965_v43 }
  0xc4   :  { %v476_v45 = vpop.f32.mrf.mxu2  ;;  %v450_v58 = vpop.f32.mrf.mxu0  ;;  %973 = vmatpush.msrb.mxu0 %v964_v44  ;;  %1519 = vmatpush.msrb.mxu1 %v964_v44 }
  0xc5   :  { %v451_v59 = vadd.f32 %v450_v58, %v179_v40  ;;  %v464_v60 = vpop.f32.mrf.mxu1  ;;  %v477_v3 = vadd.f32 %v476_v45, %v463_v57  ;;  %v1502_v40 = vld [vmem:[#allocation10 + $0x8] sm:$0xff]  ;;  %v958_v45 = vld [vmem:[#allocation11 + $0x38] sm:$0xff] }
  0xc6   :  { %927 = vmatpush.bf16.msra.mxu2 %v1502_v40  ;;  %974 = vmatpush.msrb.mxu0 %v963_v47 }
  0xc7   :  { %v465_v4 = vadd.f32 %v464_v60, %v451_v59  ;;  %v523_v6 = vmax.f32 %v477_v3, 0.0  ;;  %1520 = vmatpush.msrb.mxu1 %v963_v47  ;;  %v563_v59 = vperm.slane %v561_v51, 0 }
  0xc8   :  { %975 = vmatpush.msrb.mxu0 %v962_v49 }
  0xc9   :  { %v490_v10 = vpop.f32.mrf.mxu3  ;;  %1521 = vmatpush.msrb.mxu1 %v962_v49 }
  0xca   :  { %v491_v14 = vadd.f32 %v490_v10, %v180_v11  ;;  %928 = vmatpush.bf16.msra.mxu2 %v1501_v41  ;;  %976 = vmatpush.msrb.mxu0 %v961_v50 }
  0xcb   :  { %1522 = vmatpush.msrb.mxu1 %v961_v50 }
  0xcc   :  { %v478_v5 = vpop.f32.mrf.mxu2  ;;  %977 = vmatpush.msrb.mxu0 %v960_v52 }
  0xcd   :  { %v479_v7 = vadd.f32 %v478_v5, %v465_v4  ;;  %1523 = vmatpush.msrb.mxu1 %v960_v52 }
  0xce   :  { %978 = vmatpush.msrb.mxu0 %v959_v56 }
  0xcf   :  { %v525_v8 = vmax.f32 %v479_v7, 0.0  ;;  %1524 = vmatpush.msrb.mxu1 %v959_v56 }
  0xd0   :  { %979 = vmatpush.msrb.mxu0 %v958_v45 }
  0xd1   :  { %v527_v9 = vpack.c.bf16 %v525_v8, %v523_v6  ;;  %v492_v15 = vpop.f32.mrf.mxu3  ;;  %1525 = vmatpush.msrb.mxu1 %v958_v45 }
  0xd2   :  { %v493_v17 = vadd.f32 %v492_v15, %v180_v11  ;;  %v954_v15 = vld [vmem:[#allocation11 + $0x18] sm:$0xff] }
  0xd3   :  { %735 = vmatmul.bf16.vlgmr.msrb.gmra.mxu2 %v527_v9  ;;  %763 = vmatmul.bf16.vlgmr.msra.gmra.mxu0 %v527_v9 }
  0xdc   :  { %v504_v12 = vpop.f32.mrf.mxu0 }
  0xdd   :  { %v518_v13 = vpop.f32.mrf.mxu1  ;;  %v505_v16 = vadd.f32 %v504_v12, %v491_v14  ;;  %v957_v12 = vld [vmem:[#allocation11 + $0x30] sm:$0xff]  ;;  %v955_v14 = vld [vmem:[#allocation11 + $0x20] sm:$0xff] }
  0xde   :  { %980 = vmatpush.msrb.mxu0 %v957_v12  ;;  %1526 = vmatpush.msrb.mxu1 %v957_v12 }
  0xdf   :  { %v519_v19 = vadd.f32 %v518_v13, %v505_v16  ;;  %v956_v13 = vld [vmem:[#allocation11 + $0x28] sm:$0xff]  ;;  %v953_v16 = vld [vmem:[#allocation11 + $0x10] sm:$0xff] }
  0xe0   :  { %981 = vmatpush.msrb.mxu0 %v956_v13  ;;  %1527 = vmatpush.msrb.mxu1 %v956_v13 }
  0xe1   :  { %v524_v23 = vmax.f32 %v519_v19, 0.0  ;;  %v1546_v19 = vld [vmem:[%s1845_s6] ss:$0 sm:$0xff]  ;;  %s1738_s6 = smov [#allocation13]  }
  0xe2   :  { %982 = vmatpush.msrb.mxu0 %v955_v14  ;;  %1528 = vmatpush.msrb.mxu1 %v955_v14  ;;  %s1004_s23 = sshll.u32 %s1738_s6, 4  ;;  %s1005_s23 = int_to_ptr.vmem [resolvable:$true] %s1004_s23 }
  0xe4   :  { %v506_v18 = vpop.f32.mrf.mxu0  ;;  %983 = vmatpush.msrb.mxu0 %v954_v15  ;;  %1529 = vmatpush.msrb.mxu1 %v954_v15 }
  0xe5   :  { %v507_v20 = vadd.f32 %v506_v18, %v493_v17  ;;  %v520_v21 = vpop.f32.mrf.mxu1  ;;  %v952_v17 = vld [vmem:[#allocation11 + $0x8] sm:$0xff]  ;;  %v951_v18 = vld [vmem:[#allocation11] sm:$0xff] }
  0xe6   :  { %984 = vmatpush.msrb.mxu0 %v953_v16  ;;  %1530 = vmatpush.msrb.mxu1 %v953_v16 }
  0xe7   :  { %v521_v22 = vadd.f32 %v520_v21, %v507_v20 }
  0xe8   :  { %985 = vmatpush.msrb.mxu0 %v952_v17  ;;  %1531 = vmatpush.msrb.mxu1 %v952_v17 }
  0xe9   :  { %v526_v24 = vmax.f32 %v521_v22, 0.0 }
  0xea   :  { %986 = vmatpush.msrb.mxu0 %v951_v18  ;;  %1532 = vmatpush.msrb.mxu1 %v951_v18 }
  0xeb   :  { %v528_v25 = vpack.c.bf16 %v526_v24, %v524_v23 }
  0xed   :  { %749 = vmatmul.bf16.vlgmr.msrb.gmra.mxu3 %v528_v25  ;;  %777 = vmatmul.bf16.vlgmr.msra.gmra.mxu1 %v528_v25 }
 0x150   :  { %v764_v48 = vpop.f32.mrf.mxu0 }
 0x151   :  { %v765_v57 = vadd.f32 %v764_v48, %v564_v55 }
 0x156   :  { %v736_v53 = vpop.f32.mrf.mxu2 }
 0x157   :  { %v737_v1 = vadd.f32 %v736_v53, %v563_v59 }
 0x158   :  { %v766_v46 = vpop.f32.mrf.mxu0 }
 0x159   :  { %v767_v60 = vadd.f32 %v766_v46, %v564_v55 }
 0x15e   :  { %v738_v0 = vpop.f32.mrf.mxu2 }
 0x15f   :  { %v739_v4 = vadd.f32 %v738_v0, %v563_v59 }
 0x16a   :  { %v778_v54 = vpop.f32.mrf.mxu1 }
 0x16b   :  { %v779_v61 = vadd.f32 %v778_v54, %v765_v57 }
 0x16d   :  { %v784_v2 = vmax.f32 %v779_v61, 0.0 }
 0x170   :  { %v750_v58 = vpop.f32.mrf.mxu3 }
 0x171   :  { %v751_v5 = vadd.f32 %v750_v58, %v737_v1 }
 0x172   :  { %v780_v62 = vpop.f32.mrf.mxu1 }
 0x173   :  { %v781_v63 = vadd.f32 %v780_v62, %v767_v60  ;;  %v783_v9 = vmax.f32 %v751_v5, 0.0 }
 0x175   :  { %v786_v3 = vmax.f32 %v781_v63, 0.0 }
 0x177   :  { %v788_v6 = vpack.c.bf16 %v786_v3, %v784_v2 }
 0x178   :  { %v752_v7 = vpop.f32.mrf.mxu3 }
 0x179   :  { %v753_v8 = vadd.f32 %v752_v7, %v739_v4  ;;  %943 = vmatmul.bf16.vlgmr.msra.gmra.mxu3 %v788_v6 }
 0x17b   :  { %v785_v10 = vmax.f32 %v753_v8, 0.0 }
 0x17d   :  { %v787_v11 = vpack.c.bf16 %v785_v10, %v783_v9 }
 0x17f   :  { %929 = vmatmul.bf16.vlgmr.msra.gmra.mxu2 %v787_v11 }
 0x1fc   :  { %v944_v20 = vpop.f32.mrf.mxu3 }
 0x202   :  { %v930_v21 = vpop.f32.mrf.mxu2 }
 0x203   :  { %v931_v22 = vadd.f32 %v1546_v19, %v930_v21 }
 0x204   :  { %v946_v27 = vpop.f32.mrf.mxu3 }
 0x205   :  { %v945_v23 = vadd.f32 %v944_v20, %v931_v22 }
 0x207   :  { %v949_v24 = vmax.f32 %v945_v23, 0.0 }
 0x209   :  { %987 = vmatmul.f32.vlgmr.msrb.gmra.mxu0 %v949_v24 }
 0x20a   :  { %v932_v25 = vpop.f32.mrf.mxu2 }
 0x20b   :  { %v933_v26 = vadd.f32 %v1546_v19, %v932_v25 }
 0x20d   :  { %v947_v28 = vadd.f32 %v946_v27, %v933_v26 }
 0x20f   :  { %v950_v29 = vmax.f32 %v947_v28, 0.0 }
 0x211   :  { %990 = vmatmul.f32.vlgmr.msrb.gmra.mxu1 %v950_v29 }
 0x286   :  { %v988_v31 = vpop.f32.mrf.mxu0 }
 0x287   :  { %v989_v32 = vadd.f32 %v1547_v30, %v988_v31 }
 0x289   :  { %v994_v33 = vmax.f32 %v989_v32, 0.0 }
 0x28b   :  { %v996_v34 = vadd.f32 0.0001, %v994_v33 }
 0x28d   :  { %998 = vst [vmem:[#allocation13] sm:$0xff] %v996_v34 }
 0x28e   :  { %v991_v35 = vpop.f32.mrf.mxu1 }
 0x28f   :  { %v992_v36 = vadd.f32 %v1547_v30, %v991_v35 }
 0x291   :  { %v995_v37 = vmax.f32 %v992_v36, 0.0 }
 0x293   :  { %v997_v38 = vadd.f32 0.0001, %v995_v37 }
 0x295   :  { %999 = vst [vmem:[#allocation13 + $0x8] sm:$0xff] %v997_v38 }
 0x296   :  { %1012 = dma.vmem_to_hbm [thread:$0]  %s1005_s23, 256, %s1007_s26, [#allocation4], %s1727_s17, %s1727_s17, %s1728_s18  }
 0x297   :  { %1724 = dma.done.wait [#allocation4], 256  }
 0x298   :  { %1725 = vsyncadd [#allocation4], 4294967040 }
 0x299   :  { %1017 = vsyncpa [#allocation3], 1 }
 0x29a   :  { %1018 = vsyncpa [#allocation6], 1 }
 0x29b   :  { %1019 = vsyncpa [#allocation9], 1 }
 0x29c   :  { %1020 = vsyncpa [#allocation12], 1 }
 0x29d   :  { %1021 = vsyncpa [#allocation4], 1 }

</bundles_post_ra>
